<compile_context>
chip_gen: v5e
topology: v5e:2x2
jax: 0.10.0
libtpu: 0.0.40
codegen_flags: <defaults>
</compile_context>

<pallas_src>
import functools

import jax
import jax.numpy as jnp
from jax.experimental import pallas as pl
from jax.experimental.pallas import tpu as pltpu

LOGIT_LAPLACE_EPS = 0.1          # DALL-E's unmap_pixels epsilon
CP_DEC = 8                       # decoder channels kept (3 used, padded to 8)
VMEM_LIMIT = 32 * 1024 * 1024    # safe scoped-VMEM budget on v5e/v6e/v7x


def _round_up(x, m):
    return (x + m - 1) // m * m


def _pick_row_tile(R, requested):
    """Row tile: multiple of 16 (bf16 sublanes); >=2 row tiles when possible
    so the v7x second TensorCore is not idle."""
    tm = min(requested, _round_up(R, 16))
    tm = max(16, _round_up(tm, 16))
    while tm > 16 and _round_up(R, tm) // tm < 2:
        tm = _round_up(tm // 2, 16)
    return tm


# ---- Kernel 1: tiled lm_head matmul (bf16 MXU, f32 acc) + online argmax ----
def head_argmax_kernel(x_ref, w_ref, b_ref, pred_ref, max_sc, arg_sc, *, tv):
    v = pl.program_id(1)

    @pl.when(v == 0)
    def _init():
        max_sc[...] = jnp.full_like(max_sc, -jnp.inf)
        arg_sc[...] = jnp.zeros_like(arg_sc)

    # x/w are already bf16 (cast once in the wrapper); f32 accumulate + f32 bias
    logits = jnp.dot(x_ref[...], w_ref[...],
                     preferred_element_type=jnp.float32)             # (tm, tv)
    logits = logits + b_ref[...]

    # per-tile max + first-occurrence index within the tile; (1, tv) iota
    tile_max = jnp.max(logits, axis=-1, keepdims=True)               # (tm, 1)
    lane = jax.lax.broadcasted_iota(jnp.int32, (1, tv), 1)           # (1, tv)
    local_arg = jnp.min(jnp.where(logits == tile_max, lane, tv),
                        axis=-1, keepdims=True)                      # (tm, 1)
    global_arg = v * tv + local_arg

    # strict '>' keeps the earliest tile on cross-tile ties -> first-occurrence
    # semantics match jnp.argmax / torch.argmax.
    better = tile_max > max_sc[...]
    arg_sc[...] = jnp.where(better, global_arg, arg_sc[...])
    max_sc[...] = jnp.where(better, tile_max, max_sc[...])

    @pl.when(v == pl.num_programs(1) - 1)
    def _finalize():
        pred_ref[...] = arg_sc[...]


# ---- Kernel 2: one-hot(pred) @ dec_w[:, :3] on MXU + bias, sigmoid, unmap ----
def onehot_decode_kernel(pred_ref, w3_ref, b3_ref, out_ref, *, tv):
    # pred_ref: (tm, 1) int32; w3_ref: (tv, CP_DEC) f32; out_ref: (tm, CP_DEC).
    # Output block index is constant over the vocab axis -> out_ref is the
    # accumulator (no VMEM scratch needed).
    v = pl.program_id(1)

    lane = jax.lax.broadcasted_iota(jnp.int32, (1, tv), 1) + v * tv  # (1, tv)
    onehot = (pred_ref[...] == lane).astype(jnp.float32)             # (tm, tv)
    part = jnp.dot(onehot, w3_ref[...],
                   preferred_element_type=jnp.float32)               # (tm, CP)

    @pl.when(v == 0)
    def _init():
        out_ref[...] = part

    @pl.when(v > 0)
    def _acc():
        out_ref[...] += part

    @pl.when(v == pl.num_programs(1) - 1)
    def _finalize():
        x = out_ref[...] + b3_ref[...]
        x = jax.nn.sigmoid(x)
        out_ref[...] = jnp.clip(
            (x - LOGIT_LAPLACE_EPS) / (1.0 - 2.0 * LOGIT_LAPLACE_EPS), 0.0, 1.0)


# ----------------------------- Wrapper -----------------------------
def beit_decoder_forward(latent, head_w, head_b, dec_w, dec_b, grid_size,
                         *, tm=None, tv=1024, tv_dec=2048):
    """latent: (B, 1 + G*G, H).  Returns (B, 3, G, G)."""
    B = latent.shape[0]
    x = latent[:, 1:]                                  # drop CLS token (glue)
    S, H = x.shape[1], x.shape[2]
    V = head_w.shape[1]
    assert S == grid_size * grid_size

    # ---- tile sizing ----
    R = B * S
    if tm is None:
        tm = 1024 if R >= 4096 else 512        # bigger tm -> fewer W re-streams
    tm = _pick_row_tile(R, tm)
    R_pad = _round_up(R, tm)
    n_r = R_pad // tm

    tv = min(tv, V)
    tv_dec = min(tv_dec, V)
    assert V % tv == 0 and (tv % 128 == 0 or tv == V)
    assert V % tv_dec == 0 and (tv_dec % 128 == 0 or tv_dec == V)
    n_v = V // tv
    n_vd = V // tv_dec

    # ---- data / weight prep (glue) ----
    # bf16 activations + head weight: half the HBM traffic, MXU-native.
    x_rows = x.reshape(R, H).astype(jnp.bfloat16)
    if R_pad != R:
        x_rows = jnp.pad(x_rows, ((0, R_pad - R), (0, 0)))
    head_w_bf16 = head_w.astype(jnp.bfloat16)
    head_b_row = head_b.reshape(1, V).astype(jnp.float32)
    # Only 3 decoder channels are ever used -> slice + pad to 8 lanes.
    # Kept f32 because the module runs its decoder in float32.
    dec_w3 = jnp.zeros((V, CP_DEC), jnp.float32).at[:, :3].set(
        dec_w[:, :3].astype(jnp.float32))
    dec_b3 = jnp.zeros((1, CP_DEC), jnp.float32).at[:, :3].set(
        dec_b[:3].astype(jnp.float32))

    # ---- Kernel 1: lm_head + online argmax (rows parallel, vocab streamed) ----
    pred = pl.pallas_call(
        functools.partial(head_argmax_kernel, tv=tv),
        out_shape=jax.ShapeDtypeStruct((R_pad, 1), jnp.int32),
        grid=(n_r, n_v),
        in_specs=[
            pl.BlockSpec((tm, H), lambda r, v: (r, 0)),
            pl.BlockSpec((H, tv), lambda r, v: (0, v)),
            pl.BlockSpec((1, tv), lambda r, v: (0, v)),
        ],
        out_specs=pl.BlockSpec((tm, 1), lambda r, v: (r, 0)),
        scratch_shapes=[pltpu.VMEM((tm, 1), jnp.float32),
                        pltpu.VMEM((tm, 1), jnp.int32)],
        compiler_params=pltpu.CompilerParams(
            dimension_semantics=("parallel", "arbitrary"),
            vmem_limit_bytes=VMEM_LIMIT),
    )(x_rows, head_w_bf16, head_b_row)

    # ---- Kernel 2: one-hot gather on MXU + sigmoid + unmap_pixels ----
    out = pl.pallas_call(
        functools.partial(onehot_decode_kernel, tv=tv_dec),
        out_shape=jax.ShapeDtypeStruct((R_pad, CP_DEC), jnp.float32),
        grid=(n_r, n_vd),
        in_specs=[
            pl.BlockSpec((tm, 1), lambda r, v: (r, 0)),
            pl.BlockSpec((tv_dec, CP_DEC), lambda r, v: (v, 0)),
            pl.BlockSpec((1, CP_DEC), lambda r, v: (0, 0)),
        ],
        out_specs=pl.BlockSpec((tm, CP_DEC), lambda r, v: (r, 0)),
        compiler_params=pltpu.CompilerParams(
            dimension_semantics=("parallel", "arbitrary"),
            vmem_limit_bytes=VMEM_LIMIT),
    )(pred, dec_w3, dec_b3)

    # take first 3 output channels, NHWC -> NCHW (glue)
    x_rec = out[:R, :3].reshape(B, grid_size, grid_size, 3).transpose(0, 3, 1, 2)
    return x_rec


# --------------------------- Reference ---------------------------
def reference(latent, head_w, head_b, dec_w, dec_b, grid_size):
    B = latent.shape[0]
    x = latent[:, 1:]
    # Same numerics as the kernel: bf16 operands, f32 accumulation, f32 bias.
    logits = jnp.dot(x.astype(jnp.bfloat16), head_w.astype(jnp.bfloat16),
                     preferred_element_type=jnp.float32) + head_b
    pred = jnp.argmax(logits, axis=-1)                      # (B, S)
    x_stats = dec_w[pred][..., :3] + dec_b[:3]              # row gather == onehot @ W
    xr = jax.nn.sigmoid(x_stats)
    xr = jnp.clip((xr - LOGIT_LAPLACE_EPS) / (1.0 - 2.0 * LOGIT_LAPLACE_EPS),
                  0.0, 1.0)
    return xr.reshape(B, grid_size, grid_size, 3).transpose(0, 3, 1, 2)


if __name__ == "__main__":
    # Small synthetic shapes (real module: hidden=768, vocab=8192, grid=14).
    B, H, V, G, C = 2, 32, 256, 4, 6
    S = 1 + G * G  # CLS token + patch tokens

    key = jax.random.PRNGKey(0)
    k1, k2, k3, k4, k5 = jax.random.split(key, 5)
    latent = jax.random.normal(k1, (B, S, H), dtype=jnp.float32)
    head_w = jax.random.normal(k2, (H, V), dtype=jnp.float32) * 0.1
    head_b = jax.random.normal(k3, (V,), dtype=jnp.float32) * 0.1
    dec_w = jax.random.normal(k4, (V, C), dtype=jnp.float32) * 0.1
    dec_b = jax.random.normal(k5, (C,), dtype=jnp.float32) * 0.1

    # small vocab tiles so both kernels exercise multi-tile vocab streaming;
    # row tiling (tm) is chosen adaptively (-> 16 here, 2 row tiles).
    out = beit_decoder_forward(latent, head_w, head_b, dec_w, dec_b, G,
                               tv=128, tv_dec=128)
    out = jax.block_until_ready(out)

    ref = reference(latent, head_w, head_b, dec_w, dec_b, G)
    assert out.shape == (B, 3, G, G)
    assert jnp.allclose(out, ref, atol=1e-5, rtol=1e-5)

    print("KERNEL_OK")
</pallas_src>

<mosaic_0001>
module attributes {stable_mosaic.version = 11 : i64} {
  func.func @head_argmax_kernel(%arg0: i32, %arg1: i32, %arg2: memref<16x32xbf16, #tpu.memory_space<vmem>>, %arg3: memref<32x128xbf16, #tpu.memory_space<vmem>>, %arg4: memref<1x128xf32, #tpu.memory_space<vmem>>, %arg5: memref<16x1xi32, #tpu.memory_space<vmem>>, %arg6: memref<16x1xf32, #tpu.memory_space<vmem>>, %arg7: memref<16x1xi32, #tpu.memory_space<vmem>>) attributes {dimension_semantics = [#tpu.dimension_semantics<parallel>, #tpu.dimension_semantics<arbitrary>], iteration_bounds = array<i64: 2, 2>, scalar_prefetch = 0 : i64, scratch_operands = 2 : i64, tpu.core_type = #tpu.core_type<tc>, window_params = [{transform_indices = @transform_0, window_bounds = array<i64: 16, 32>}, {transform_indices = @transform_1, window_bounds = array<i64: 32, 128>}, {transform_indices = @transform_2, window_bounds = array<i64: 1, 128>}, {transform_indices = @transform_3, window_bounds = array<i64: 16, 1>}]} {
    %c0_i32 = arith.constant 0 : i32
    %0 = arith.cmpi eq, %arg1, %c0_i32 : i32
    %1 = arith.extui %0 : i1 to i32
    %c0_i32_0 = arith.constant 0 : i32
    %2 = arith.cmpi ne, %1, %c0_i32_0 : i32
    scf.if %2 {
      %cst_20 = arith.constant 0xFF800000 : f32
      %34 = vector.broadcast %cst_20 : f32 to vector<16x1xf32>
      %c0_21 = arith.constant 0 : index
      %c0_22 = arith.constant 0 : index
      %35 = vector.load %arg6[%c0_21, %c0_22] : memref<16x1xf32, #tpu.memory_space<vmem>>, vector<16x1xf32>
      tpu.vector_store %arg6[%c0_21, %c0_22], %34 {strides = array<i32>} : memref<16x1xf32, #tpu.memory_space<vmem>>, vector<16x1xf32>,
      %c0_i32_23 = arith.constant 0 : i32
      %36 = vector.broadcast %c0_i32_23 : i32 to vector<16x1xi32>
      %c0_24 = arith.constant 0 : index
      %c0_25 = arith.constant 0 : index
      %37 = vector.load %arg7[%c0_24, %c0_25] : memref<16x1xi32, #tpu.memory_space<vmem>>, vector<16x1xi32>
      tpu.vector_store %arg7[%c0_24, %c0_25], %36 {strides = array<i32>} : memref<16x1xi32, #tpu.memory_space<vmem>>, vector<16x1xi32>,
    } else {
    }
    %c0 = arith.constant 0 : index
    %c0_1 = arith.constant 0 : index
    %3 = vector.load %arg2[%c0, %c0_1] : memref<16x32xbf16, #tpu.memory_space<vmem>>, vector<16x32xbf16>
    %c0_2 = arith.constant 0 : index
    %c0_3 = arith.constant 0 : index
    %4 = vector.load %arg3[%c0_2, %c0_3] : memref<32x128xbf16, #tpu.memory_space<vmem>>, vector<32x128xbf16>
    %cst = arith.constant dense<0.000000e+00> : vector<16x128xf32>
    %5 = tpu.matmul %3, %4, %cst {dimension_numbers = #tpu.dot_dimension_numbers<[1], [0], [0], [1], [0, 0, 1, 1], [], []>} : vector<16x32xbf16>, vector<32x128xbf16>, vector<16x128xf32> -> vector<16x128xf32>
    %c0_4 = arith.constant 0 : index
    %c0_5 = arith.constant 0 : index
    %6 = vector.load %arg4[%c0_4, %c0_5] : memref<1x128xf32, #tpu.memory_space<vmem>>, vector<1x128xf32>
    %7 = vector.broadcast %6 : vector<1x128xf32> to vector<16x128xf32>
    %8 = arith.addf %5, %7 : vector<16x128xf32>
    %cst_6 = arith.constant dense<0xFF800000> : vector<16xf32>
    %9 = vector.multi_reduction <maximumf>, %8, %cst_6 [1] : vector<16x128xf32> to vector<16xf32>
    %10 = vector.shape_cast %9 : vector<16xf32> to vector<16x1xf32>
    %11 = tpu.iota {dimensions = array<i32: 1>} : vector<1x128xi32>
    %12 = vector.broadcast %10 : vector<16x1xf32> to vector<16x128xf32>
    %13 = arith.cmpf oeq, %8, %12 : vector<16x128xf32>
    %c128_i32 = arith.constant 128 : i32
    %14 = vector.shape_cast %11 : vector<1x128xi32> to vector<1x128xi32>
    %15 = vector.broadcast %14 : vector<1x128xi32> to vector<16x128xi32>
    %16 = vector.broadcast %c128_i32 : i32 to vector<16x128xi32>
    %17 = arith.select %13, %15, %16 : vector<16x128xi1>, vector<16x128xi32>
    %cst_7 = arith.constant dense<2147483647> : vector<16xi32>
    %18 = vector.multi_reduction <minsi>, %17, %cst_7 [1] : vector<16x128xi32> to vector<16xi32>
    %19 = vector.shape_cast %18 : vector<16xi32> to vector<16x1xi32>
    %c128_i32_8 = arith.constant 128 : i32
    %20 = arith.muli %arg1, %c128_i32_8 : i32
    %21 = vector.broadcast %20 : i32 to vector<16x1xi32>
    %22 = arith.addi %21, %19 : vector<16x1xi32>
    %c0_9 = arith.constant 0 : index
    %c0_10 = arith.constant 0 : index
    %23 = vector.load %arg6[%c0_9, %c0_10] : memref<16x1xf32, #tpu.memory_space<vmem>>, vector<16x1xf32>
    %24 = arith.cmpf ogt, %10, %23 : vector<16x1xf32>
    %c0_11 = arith.constant 0 : index
    %c0_12 = arith.constant 0 : index
    %25 = vector.load %arg7[%c0_11, %c0_12] : memref<16x1xi32, #tpu.memory_space<vmem>>, vector<16x1xi32>
    %26 = arith.select %24, %22, %25 : vector<16x1xi1>, vector<16x1xi32>
    %c0_13 = arith.constant 0 : index
    %c0_14 = arith.constant 0 : index
    %27 = vector.load %arg7[%c0_13, %c0_14] : memref<16x1xi32, #tpu.memory_space<vmem>>, vector<16x1xi32>
    tpu.vector_store %arg7[%c0_13, %c0_14], %26 {strides = array<i32>} : memref<16x1xi32, #tpu.memory_space<vmem>>, vector<16x1xi32>,
    %c0_15 = arith.constant 0 : index
    %c0_16 = arith.constant 0 : index
    %28 = vector.load %arg6[%c0_15, %c0_16] : memref<16x1xf32, #tpu.memory_space<vmem>>, vector<16x1xf32>
    %29 = arith.select %24, %10, %28 : vector<16x1xi1>, vector<16x1xf32>
    %c0_17 = arith.constant 0 : index
    %c0_18 = arith.constant 0 : index
    %30 = vector.load %arg6[%c0_17, %c0_18] : memref<16x1xf32, #tpu.memory_space<vmem>>, vector<16x1xf32>
    tpu.vector_store %arg6[%c0_17, %c0_18], %29 {strides = array<i32>} : memref<16x1xf32, #tpu.memory_space<vmem>>, vector<16x1xf32>,
    %c1_i32 = arith.constant 1 : i32
    %31 = arith.cmpi eq, %arg1, %c1_i32 : i32
    %32 = arith.extui %31 : i1 to i32
    %c0_i32_19 = arith.constant 0 : i32
    %33 = arith.cmpi ne, %32, %c0_i32_19 : i32
    scf.if %33 {
      %c0_20 = arith.constant 0 : index
      %c0_21 = arith.constant 0 : index
      %34 = vector.load %arg7[%c0_20, %c0_21] : memref<16x1xi32, #tpu.memory_space<vmem>>, vector<16x1xi32>
      %c0_22 = arith.constant 0 : index
      %c0_23 = arith.constant 0 : index
      %35 = vector.load %arg5[%c0_22, %c0_23] : memref<16x1xi32, #tpu.memory_space<vmem>>, vector<16x1xi32>
      tpu.vector_store %arg5[%c0_22, %c0_23], %34 {strides = array<i32>} : memref<16x1xi32, #tpu.memory_space<vmem>>, vector<16x1xi32>,
    } else {
    }
    return
  }
  func.func @transform_0(%arg0: i32, %arg1: i32) -> (i32, i32) {
    %c0_i32 = arith.constant 0 : i32
    %c0_i32_0 = arith.constant 0 : i32
    return %arg0, %c0_i32 : i32, i32
  }
  func.func @transform_1(%arg0: i32, %arg1: i32) -> (i32, i32) {
    %c0_i32 = arith.constant 0 : i32
    %c0_i32_0 = arith.constant 0 : i32
    return %c0_i32, %arg1 : i32, i32
  }
  func.func @transform_2(%arg0: i32, %arg1: i32) -> (i32, i32) {
    %c0_i32 = arith.constant 0 : i32
    %c0_i32_0 = arith.constant 0 : i32
    return %c0_i32, %arg1 : i32, i32
  }
  func.func @transform_3(%arg0: i32, %arg1: i32) -> (i32, i32) {
    %c0_i32 = arith.constant 0 : i32
    %c0_i32_0 = arith.constant 0 : i32
    return %arg0, %c0_i32 : i32, i32
  }
}

</mosaic_0001>

<bundles_post_ra>
// kernel: tpu_custom_call.1
= control target key start
LH: loop header
LB: loop body
LE: loop exit
PB: predicated region body
PF: predicated region fallthrough
CT: control target
= control target key end

     0   :  { %s1117_s0 = inlined_call_operand.hbm [shape: bf16[32,32], index: 0, kind: input, shape index: {}]   ;;  %s1118_s1 = inlined_call_operand.hbm [shape: bf16[32,256], index: 1, kind: input, shape index: {}]   ;;  %s1119_s2 = inlined_call_operand.hbm [shape: f32[1,256], index: 2, kind: input, shape index: {}]   ;;  %s1120_s3 = inlined_call_operand.vmem [shape: s32[32,1], index: 3, kind: output, shape index: {}]  }
   0x1   :  { %1130 = sst [smem:[#allocation18_spill]] %s1118_s1 }
   0x2   :  { %1131 = sst [smem:[#allocation19_spill]] %s1120_s3 }
   0x3   :  { %8 = vsyncpa [#allocation5], 0 }
   0x4   :  { %10 = vsyncpa [#allocation5 + $0x1], 0 }
   0x5   :  { %11 = vsyncpa [#allocation7], 0 }
   0x6   :  { %13 = vsyncpa [#allocation7 + $0x1], 0  ;;  %s878_s12 = smov 0   ;;  %s880_s13 = smov 0  }
   0x7   :  { %s882_s14 = smov 0   ;;  %s884_s15 = smov 0  }
   0x8   :  { %s886_s16 = smov 0   ;;  %s888_s17 = smov 0  }
   0x9   :  { %s890_s18 = smov 0   ;;  %s892_s19 = smov 0  }
   0xa   :  { %s894_s20 = smov 0   ;;  %s896_s21 = smov 0  }
   0xb   :  { %s898_s22 = smov 0  }
   0xc LB: > { %1132 = sst [smem:[#allocation11_spill]] %s831_s17  ;;  %s28_s23 = sadd.s32 1, %s843_s20  ;;  %s851_s22 = sphi %s898_s22, %s19_s22   ;;  %s847_s21 = sphi %s896_s21, %s1159_s21   ;;  %s843_s20 = sphi %s894_s20, %s1166_s20   ;;  %s839_s19 = sphi %s892_s19, %s1157_s19   ;;  %s835_s18 = sphi %s890_s18, %s1165_s18   ;;  %s831_s17 = sphi %s888_s17, %s1156_s17   ;;  %s827_s16 = sphi %s886_s16, %s1164_s16   ;;  %s823_s15 = sphi %s884_s15, %s1163_s15   ;;  %s819_s14 = sphi %s882_s14, %s1162_s14   ;;  %s815_s13 = sphi %s880_s13, %s1161_s13   ;;  %s811_s12 = sphi %s878_s12, %s1160_s12  }
   0xd   : > { %1133 = sst [smem:[#allocation12_spill]] %s835_s18  ;;  %p46_p0 = scmp.eq.s32.totalorder %s851_s22, 0 }
   0xe   : > { %1134 = sst [smem:[#allocation13_spill]] %s847_s21  ;;  %p935_p1 = scmp.ge.s32.totalorder %s28_s23, 2 }
   0xf   : > { %s64_s25 = sadd.s32 1, %s819_s14  ;;  %p71_p2 = scmp.ne.s32.totalorder %s819_s14, %s815_s13 }
  0x10   : > { %p77_p3 = scmp.ne.s32.totalorder %s815_s13, %s811_s12  ;;  %s1168_s23 = smov (%p935_p1, %s28_s23), 0 }
  0x11   : > { %1136 = sst [smem:[#allocation14_spill]] %s1168_s23  ;;  %p950_p4 = por %p71_p2, %p46_p0 }
  0x12   : > { %s61_s27 = ssub.s32 %s843_s20, %s1168_s23  ;;  %p572_p5 = scmp.lt.s32.totalorder %s851_s22, 4 }
  0x13   : > { %p62_p6 = scmp.eq.s32.totalorder %s61_s27, 0  ;;  %s175_s28 = sand.u32 1, %s851_s22  }
  0x14   : > { %s1124_s30 = sand.u32 1, %s819_s14   ;;  %s528_s5 = sshll.u32 %s843_s20, 2 }
  0x15   : > { %s959_s29 = scalar_select %p62_p6, %s819_s14, %s64_s25  }
  0x16   : > { %s527_s4 = sshll.u32 %s1124_s30, 4  ;;  %s1139_s1 = sld [smem:[#allocation18_spill]] }
  0x17   : > { %1138 = sst [smem:[#allocation15_spill]] %s959_s29  ;;  %s179_s10 = scalar_lea.vmem [#allocation6], %s527_s4 }
  0x18   : > { %s186_s11 = sshll.u32 %s179_s10, 4  ;;  %p972_p7 = pnand %p572_p5, %p950_p4  ;;  %s187_s11 = int_to_ptr.vmem [resolvable:$true] %s186_s11 }
  0x19   : > { %p529_p8 = scmp.ge.s32.totalorder %s851_s22, 1  ;;  %p211_p9 = scmp.lt.s32.totalorder %s851_s22, 5 }
  0x1a   : > { %s978_s27 = scalar_lea.sflag [#allocation7], %s175_s28  ;;  %s853_s4 = smov 128  }
  0x1b   : > { %s1123_s26 = smov 4   ;;  %p985_p10 = pnand %p529_p8, %p211_p9 }
  0x1c   : > { %s183_s8 = scalar_lea.hbm %s1139_s1, %s528_s5  ;;  %s1122_s5 = smov 64  }
  0x1d   : > { %s184_s9 = sshll.u32 %s183_s8, 4  ;;  %s1121_s7 = sadd.s32 4294967295, %s851_s22   ;;  %s185_s9 = int_to_ptr.hbm [resolvable:$true] %s184_s9 }
  0x1e   : > { %568 = dma.hbm_to_vmem [thread:$0]  (!%p972_p7), %s185_s9, 256, %s187_s11, %s978_s27, %s853_s4, %s1122_s5, %s1123_s26  }
  0x1f   : > { %s31_s28 = sadd.s32 1, %s847_s21  ;;  %s38_s8 = sadd.s32 1, %s831_s17 }
  0x20   : > { %s1170_s28 = smov (!%p935_p1, %s31_s28), %s847_s21  ;;  %p45_p11 = scmp.ne.s32.totalorder %s831_s17, %s827_s16 }
  0x21   : > { %p33_p12 = scmp.ge.s32.totalorder %s1170_s28, 2  ;;  %p51_p13 = scmp.ne.s32.totalorder %s827_s16, %s823_s15 }
  0x22   : > { %p1001_p2 = por %p46_p0, %p45_p11  ;;  %p52_p4 = scmp.eq.s32.totalorder %s1121_s7, 0 }
  0x23   : > { %s1172_s28 = smov (%p33_p12, %s1170_s28), 0  ;;  %s153_s11 = sand.u32 1, %s831_s17  }
  0x24   : > { %1143 = sst [smem:[#allocation16_spill]] %s1172_s28  ;;  %p1009_p6 = por %p52_p4, %p51_p13 }
  0x25   : > { %p1016_p1 = por %p77_p3, %p52_p4  ;;  %s35_s9 = ssub.s32 %s847_s21, %s1172_s28 }
  0x26   : > { %p36_p0 = scmp.eq.s32.totalorder %s35_s9, 0  ;;  %s524_s4 = sshll.u32 %s153_s11, 3 }
  0x27   : > { %s552_s7 = sshll.u32 %s847_s21, 3  ;;  %s157_s12 = scalar_lea.vmem [#allocation4], %s524_s4 }
  0x28   : > { %s1025_s5 = scalar_select %p36_p0, %s831_s17, %s38_s8  }
  0x29   : > { %s162_s1 = scalar_lea.hbm %s1117_s0, %s552_s7  ;;  %s165_s29 = sshll.u32 %s157_s12, 4  ;;  %s166_s29 = int_to_ptr.vmem [resolvable:$true] %s165_s29 }
  0x2a   : > { %1146 = sst [smem:[#allocation17_spill]] %s1025_s5  ;;  %s163_s23 = sshll.u32 %s162_s1, 4  ;;  %s164_s23 = int_to_ptr.hbm [resolvable:$true] %s163_s23 }
  0x2b   : > { %p563_p3 = pnand %p572_p5, %p1001_p2  ;;  %s202_s21 = scalar_lea.hbm %s1119_s2, %s843_s20 }
  0x2c   : > { %s1147_s8 = sand.u32 1, %s819_s14   ;;  %s204_s18 = sshll.u32 %s202_s21, 4  ;;  %s205_s18 = int_to_ptr.hbm [resolvable:$true] %s204_s18 }
  0x2d   : > { %s199_s5 = scalar_lea.vmem [#allocation8], %s1147_s8  ;;  %s154_s30 = scalar_lea.sflag [#allocation5], %s153_s11 }
  0x2e   : > { %s206_s17 = sshll.u32 %s199_s5, 4  ;;  %s1148_s26 = smov 4   ;;  %s207_s17 = int_to_ptr.vmem [resolvable:$true] %s206_s17 }
  0x2f   : > { %s1149_s3 = smov 64   ;;  %215 = sbr.rel (%p985_p10) target bundleno = 594 (0x252), region = 32 }
  0x30   : > { %565 = dma.hbm_to_vmem [thread:$0]  (!%p563_p3), %s164_s23, 128, %s166_s29, %s154_s30, %s1149_s3, %s1149_s3, %s1148_s26  }
  0x31   : > { %571 = dma.hbm_to_vmem [thread:$0]  (!%p972_p7), %s205_s18, 16, %s207_s17, %s978_s27  }
  0x32   : > { %s217_s1 = sand.u32 (!%p985_p10), 1, %s827_s16  }
  0x33   : > { %s1049_s7 = sshll.u32 (!%p985_p10), %s217_s1, 3  ;;  %s218_s5 = scalar_lea.sflag (!%p985_p10), [#allocation5], %s217_s1 }
  0x34   : > { %s221_s21 = scalar_lea.vmem [#allocation4], %s1049_s7 }
  0x35   : > { %802 = dma.done.wait (%p1009_p6), %s218_s5, 128  }
  0x36   : > { %804 = vsyncadd (%p1009_p6), %s218_s5, 4294967168  ;;  %s1150_s3 = sadd.s32 4294967295, %s851_s22   ;;  %s229_s18 = sand.u32 1, %s815_s13  }
  0x37   : > { %s227_s17 = sand.u32 1, %s1150_s3   ;;  %s531_s23 = sshll.u32 %s229_s18, 4 }
  0x38   : > { %s228_s29 = scalar_lea.sflag [#allocation7], %s227_s17  ;;  %s231_s25 = scalar_lea.vmem [#allocation6], %s531_s23 }
  0x39   : > { %806 = dma.done.wait (%p1016_p1), %s228_s29, 272  }
  0x3a   : > { %808 = vsyncadd (%p1016_p1), %s228_s29, 4294967024  ;;  %s532_s27 = sshll.u32 %s839_s19, 1  ;;  %s1151_s24 = sld [smem:[#allocation19_spill]] }
  0x3b   : > { %p275_p5 = scmp.lt.s32.totalorder %s532_s27, 3  ;;  %s240_s4 = scalar_lea.vmem [#allocation8], %s229_s18 }
  0x3c   : > { %s1152_s12 = sld [smem:[#allocation12_spill]] }
  0x3d   : > { %s1174_s27 = smov (!%p275_p5, %s532_s27), 3 }
  0x3e   : > { %s533_s6 = sshll.u32 %s1174_s27, 3 }
  0x40   : > { %s1067_s11 = scalar_lea.vmem %s1151_s24, %s533_s6 }
  0x42   : > { %p534_p7 = scmp.ne.s32.totalorder %s1152_s12, 0 }
  0x44   : > { %284 = sbr.rel (%p534_p7) target bundleno = 78 (0x4e), region = 48 }
  0x49   : > { %vm285_vm0 = vcmask 7168   ;;  %v856_v0 = vmov -inf   ;;  %v857_v1 = vmov 0  }
  0x4a   : > { %286 = vst.msk [vmem:[#allocation2] sm:$0xff] %vm285_vm0, %v856_v0 }
  0x4b   : > { %287 = vst.msk [vmem:[#allocation2 + $0x8] sm:$0xff] %vm285_vm0, %v856_v0 }
  0x4c   : > { %288 = vst.msk [vmem:[#allocation3] sm:$0xff] %vm285_vm0, %v857_v1 }
  0x4d   : > { %289 = vst.msk [vmem:[#allocation3 + $0x8] sm:$0xff] %vm285_vm0, %v857_v1 }
  0x4e PF: > { %v555_v2 = vld [vmem:[%s231_s25 + $0x8] sm:$0xff]  ;;  %v554_v3 = vld [vmem:[%s231_s25] sm:$0xff]  ;;  %vm317_vm1 = vcmask 261120   ;;  %v339_v10 = vlaneseq  ;;  %vm385_vm2 = vcmask 7168   ;;  %s1153_s19 = sld [smem:[#allocation12_spill]] }
  0x4f   : > { %327 = vmatpush.bf16.msra.mxu0 %v555_v2  ;;  %v553_v4 = vld [vmem:[%s221_s21] sm:$0xff] }
  0x50   : > { %v666_v5 = vld [vmem:[%s240_s4] ss:$0 sm:$0xff]  ;;  %v340_v12 = vand.u32 127, %v339_v10 }
  0x51   : > { %v377_v11 = vld [vmem:[#allocation2] sm:$0xff] }
  0x52   : > { %v378_v18 = vld [vmem:[#allocation2 + $0x8] sm:$0xff] }
  0x53   : > { %328 = vmatpush.bf16.msra.mxu0 %v554_v3  ;;  %v381_v38 = vld [vmem:[#allocation3] sm:$0xff] }
  0x54   : > { %s548_s15 = sshll.u32 %s1153_s19, 7  ;;  %v382_v46 = vld [vmem:[#allocation3 + $0x8] sm:$0xff]  ;;  %p549_p8 = scmp.ne.s32.totalorder %s1153_s19, 1 }
  0x55   : > { %v374_v36 = vstv %s548_s15 }
  0x56   : > { %547 = vmatmul.msk.bf16.vlgmr.msra.gmra.mxu0 %vm317_vm1, %v553_v4 }
  0xd3   : > { %v330_v6 = vpop.f32.mrf.mxu0 }
  0xd4   : > { %v331_v7 = vadd.f32 %v666_v5, %v330_v6 }
  0xd6   : > { %335 = vmax.xlane.f32.xlu0 %v331_v7 }
  0xdb   : > { %v332_v8 = vpop.f32.mrf.mxu0 }
  0xdc   : > { %v333_v9 = vadd.f32 %v666_v5, %v332_v8 }
  0xde   : > { %337 = vmax.xlane.f32.xlu0 %v333_v9 }
 0x149   : > { %v336_v13 = vpop.xlane.xlu0 %335 }
 0x14a   : > { %vm341_vm3 = vcmp.eq.f32.partialorder %v331_v7, %v336_v13  ;;  %vm379_vm4 = vcmp.gt.f32.partialorder %v336_v13, %v377_v11 }
 0x14b   : > { %v390_v14 = vsel %vm379_vm4, %v336_v13, %v377_v11  ;;  %v343_v15 = vsel %vm341_vm3, %v340_v12, 128 }
 0x14c   : > { %392 = vst.msk [vmem:[#allocation2] sm:$0xff] %vm385_vm2, %v390_v14  ;;  %v346_v16 = vshra.s32 %v343_v15, 16  ;;  %v345_v24 = vand.u32 65535, %v343_v15 }
 0x14e   : > { %v348_v17 = vcvt.s32.f32 %v346_v16  ;;  %v347_v26 = vcvt.s32.f32 %v345_v24 }
 0x150   : > { %349 = vmin.xlane.f32.xlu1 %v348_v17 }
 0x151   : > { %v338_v19 = vpop.xlane.xlu0 %337 }
 0x152   : > { %vm342_vm5 = vcmp.eq.f32.partialorder %v333_v9, %v338_v19  ;;  %vm380_vm6 = vcmp.gt.f32.partialorder %v338_v19, %v378_v18 }
 0x153   : > { %v344_v20 = vsel %vm342_vm5, %v340_v12, 128  ;;  %v391_v21 = vsel %vm380_vm6, %v338_v19, %v378_v18 }
 0x154   : > { %393 = vst.msk [vmem:[#allocation2 + $0x8] sm:$0xff] %vm385_vm2, %v391_v21  ;;  %v360_v22 = vshra.s32 %v344_v20, 16  ;;  %v359_v28 = vand.u32 65535, %v344_v20 }
 0x156   : > { %v362_v23 = vcvt.s32.f32 %v360_v22  ;;  %v361_v30 = vcvt.s32.f32 %v359_v28 }
 0x158   : > { %363 = vmin.xlane.f32.xlu1 %v362_v23 }
 0x1c3   : > { %v350_v25 = vpop.xlane.xlu1 %349 }
 0x1c4   : > { %vm351_vm7 = vcmp.eq.f32.partialorder %v348_v17, %v350_v25  ;;  %v356_v32 = vcvt.f32.s32 %v350_v25 }
 0x1c5   : > { %v352_v27 = vsel %vm351_vm7, %v347_v26, inf }
 0x1c6   : > { %353 = vmin.xlane.f32.xlu2 %v352_v27  ;;  %v357_v34 = vshll.u32 %v356_v32, 16 }
 0x1cb   : > { %v364_v29 = vpop.xlane.xlu1 %363 }
 0x1cc   : > { %vm365_vm8 = vcmp.eq.f32.partialorder %v362_v23, %v364_v29  ;;  %v370_v39 = vcvt.f32.s32 %v364_v29 }
 0x1cd   : > { %v366_v31 = vsel %vm365_vm8, %v361_v30, inf }
 0x1ce   : > { %367 = vmin.xlane.f32.xlu2 %v366_v31  ;;  %v371_v43 = vshll.u32 %v370_v39, 16 }
 0x239   : > { %v354_v33 = vpop.xlane.xlu2 %353 }
 0x23a   : > { %v355_v35 = vcvt.f32.s32 %v354_v33 }
 0x23c   : > { %v358_v37 = vadd.s32 %v357_v34, %v355_v35 }
 0x23e   : > { %v375_v40 = vadd.s32 %v374_v36, %v358_v37 }
 0x240   : > { %v383_v41 = vsel %vm379_vm4, %v375_v40, %v381_v38 }
 0x241   : > { %386 = vst.msk [vmem:[#allocation3] sm:$0xff] %vm385_vm2, %v383_v41  ;;  %v368_v42 = vpop.xlane.xlu2 %367 }
 0x242   : > { %v369_v44 = vcvt.f32.s32 %v368_v42 }
 0x244   : > { %v372_v45 = vadd.s32 %v371_v43, %v369_v44 }
 0x245   : > { %397 = sbr.rel (%p549_p8) target bundleno = 594 (0x252), region = 52 }
 0x246   : > { %v376_v47 = vadd.s32 %v374_v36, %v372_v45 }
 0x248   : > { %v384_v48 = vsel %vm380_vm6, %v376_v47, %v382_v46 }
 0x249   : > { %387 = vst.msk [vmem:[#allocation3 + $0x8] sm:$0xff] %vm385_vm2, %v384_v48 }
 0x24a   : > { %v398_v49 = vld [vmem:[#allocation3] sm:$0xff] }
 0x24b   : > { %400 = vst.msk [vmem:[%s1067_s11] sm:$0xff] %vm385_vm2, %v398_v49 }
 0x250   : > { %v399_v50 = vld [vmem:[#allocation3 + $0x8] sm:$0xff] }
 0x251   : > { %401 = vst.msk [vmem:[%s1067_s11 + $0x8] sm:$0xff] %vm385_vm2, %v399_v50 }
 0x252 PF: > { %s19_s22 = sadd.s32 1, %s851_s22   ;;  %s1154_s9 = sld [smem:[#allocation15_spill]] }
 0x253   : > { %p16_p9 = scmp.ge.s32.totalorder %s19_s22, 6   ;;  %s1155_s8 = sld [smem:[#allocation11_spill]] }
 0x254   : > { %s1156_s17 = sld [smem:[#allocation17_spill]]  ;;  %s1160_s12 = smov %s815_s13 }
 0x255   : > { %s1157_s19 = sld [smem:[#allocation13_spill]]  ;;  %s1161_s13 = smov %s819_s14 }
 0x256   : > { %s1158_s30 = sld [smem:[#allocation14_spill]]  ;;  %s1163_s15 = smov %s827_s16 }
 0x257   : > { %s1159_s21 = sld [smem:[#allocation16_spill]]  ;;  %s1165_s18 = smov %s843_s20 }
 0x258   : > { %s1162_s14 = smov %s1154_s9  ;;  %18 = sbr.rel (!%p16_p9) target bundleno = 12 (0xc), region = 104 }
 0x259   : > { %s1164_s16 = smov %s1155_s8 }
 0x25c   : > { %s1166_s20 = smov %s1158_s30 }
 0x25d   :  { %424 = vsyncpa [#allocation5], 1 }
 0x25e   :  { %426 = vsyncpa [#allocation5 + $0x1], 1 }
 0x25f   :  { %427 = vsyncpa [#allocation7], 1 }
 0x260   :  { %429 = vsyncpa [#allocation7 + $0x1], 1 }

</bundles_post_ra>
